<compile_context>
chip_gen: v7x
topology: tpu7x:2x2x1
jax: 0.10.0
libtpu: 0.0.40
codegen_flags: <defaults>
</compile_context>

<pallas_src>
import jax
import jax.numpy as jnp
from jax.experimental import pallas as pl
from jax.experimental.pallas import tpu as pltpu


def _round_up(x, m):
    return (x + m - 1) // m * m


# ----------------------------- Pallas kernels -------------------------------- #
def _matmul_bias_kernel(w_ref, p_ref, b_ref, o_ref):
    # w_ref: (Cout, K)  p_ref: (K, Lp)  b_ref: (Cout, 1)  o_ref: (Cout, Lp)
    acc = jnp.dot(w_ref[...], p_ref[...], preferred_element_type=jnp.float32)
    o_ref[...] = (acc + b_ref[...]).astype(o_ref.dtype)


def _matmul_kernel(w_ref, p_ref, o_ref):
    o_ref[...] = jnp.dot(
        w_ref[...], p_ref[...],
        preferred_element_type=jnp.float32).astype(o_ref.dtype)


def _conv_matmul(w_bd, patches, bias):
    """w_bd: (Cout, K), patches: (K, Lp) with Lp % 128 == 0 (lane-dense),
    bias: (Cout, 1) or None.  Returns (Cout, Lp).  Single grid step."""
    Cout, K = w_bd.shape
    Kp, Lp = patches.shape
    assert K == Kp and Lp % 128 == 0
    out_shape = jax.ShapeDtypeStruct((Cout, Lp), patches.dtype)
    cparams = pltpu.CompilerParams(dimension_semantics=("arbitrary",))
    if bias is None:
        return pl.pallas_call(
            _matmul_kernel,
            out_shape=out_shape,
            grid=(1,),
            in_specs=[
                pl.BlockSpec((Cout, K), lambda i: (0, 0)),
                pl.BlockSpec((K, Lp), lambda i: (0, 0)),
            ],
            out_specs=pl.BlockSpec((Cout, Lp), lambda i: (0, 0)),
            compiler_params=cparams,
        )(w_bd, patches)
    return pl.pallas_call(
        _matmul_bias_kernel,
        out_shape=out_shape,
        grid=(1,),
        in_specs=[
            pl.BlockSpec((Cout, K), lambda i: (0, 0)),
            pl.BlockSpec((K, Lp), lambda i: (0, 0)),
            pl.BlockSpec((Cout, 1), lambda i: (0, 0)),
        ],
        out_specs=pl.BlockSpec((Cout, Lp), lambda i: (0, 0)),
        compiler_params=cparams,
    )(w_bd, patches, bias)


# ------------------------- conv_transpose2d wrapper -------------------------- #
def conv_transpose2d(x, w, b, stride, padding, output_padding=(0, 0),
                     dilation=(1, 1), groups=1):
    """PyTorch-semantics F.conv_transpose2d. x: (N, Cin, H, W) NCHW,
    w: (Cin, Cout//groups, KH, KW)."""
    N, Cin, H, W = x.shape
    CinW, CogPerG, KH, KW = w.shape
    assert CinW == Cin
    G = groups
    Cig = Cin // G
    Cout = CogPerG * G
    sh, sw = stride
    ph, pw = padding
    oph, opw = output_padding
    dh, dw = dilation

    # --- glue (jit-fused): zero-insertion (input dilation by stride) + pad ---
    # TODO(synk): sub-pixel (phase) decomposition would avoid the inserted zeros
    # entirely; at these sub-MFLOP sizes the op is overhead-bound so we keep the
    # simpler zero-insertion form under jit.
    Hup = (H - 1) * sh + 1
    Wup = (W - 1) * sw + 1
    x_up = jnp.zeros((N, Cin, Hup, Wup), x.dtype).at[:, :, ::sh, ::sw].set(x)
    pad_h = dh * (KH - 1) - ph
    pad_w = dw * (KW - 1) - pw
    # TODO(synk): negative effective padding (ph > dh*(KH-1)) needs cropping; not hit here.
    assert pad_h >= 0 and pad_w >= 0
    x_pad = jnp.pad(x_up, ((0, 0), (0, 0),
                           (pad_h, pad_h + oph), (pad_w, pad_w + opw)))
    Hp, Wp = x_pad.shape[-2:]
    OH = Hp - dh * (KH - 1)
    OW = Wp - dw * (KW - 1)
    L = OH * OW
    Lp = _round_up(N * L, 128)        # batch folded into lanes, padded to 128

    # --- glue: im2col, K ordered as (g, ci, kh, kw); lanes = (n, oh*ow) ---
    K = Cig * KH * KW
    x_pad_g = x_pad.reshape(N, G, Cig, Hp, Wp)
    wins = []
    for kh in range(KH):
        for kw in range(KW):
            wins.append(x_pad_g[:, :, :, kh * dh:kh * dh + OH,
                                kw * dw:kw * dw + OW])
    patches = jnp.stack(wins, axis=3)                  # (N, G, Cig, KH*KW, OH, OW)
    patches = patches.reshape(N, G * K, L)
    patches = patches.transpose(1, 0, 2).reshape(G * K, N * L)
    patches = jnp.pad(patches, ((0, 0), (0, Lp - N * L)))

    # --- glue: deconv weight -> conv weight (flip + swap io), block-diag groups ---
    w_g = w.reshape(G, Cig, CogPerG, KH, KW)
    w_conv = jnp.flip(w_g, axis=(3, 4)).transpose(0, 2, 1, 3, 4)  # (G, Cog, Cig, KH, KW)
    w_flat = w_conv.reshape(G, CogPerG, K)
    if G == 1:
        w_bd = w_flat[0]                               # (Cout, K)
    else:
        eye = jnp.eye(G, dtype=w.dtype)
        w_bd = (eye[:, None, :, None] *
                w_flat[:, :, None, :]).reshape(Cout, G * K)   # block-diagonal

    b_col = None if b is None else b.reshape(Cout, 1).astype(patches.dtype)

    # --- Pallas hot path: single MXU matmul per layer ---
    out = _conv_matmul(w_bd, patches, b_col)           # (Cout, Lp)
    out = out[:, :N * L].reshape(Cout, N, OH, OW).transpose(1, 0, 2, 3)
    return out


# ---------------------------- pure-JAX reference ----------------------------- #
def _ref_conv_transpose2d(x, w, b, stride, padding, output_padding=(0, 0),
                          dilation=(1, 1), groups=1):
    N, Cin, H, W = x.shape
    _, CogPerG, KH, KW = w.shape
    G = groups
    Cig = Cin // G
    Cout = CogPerG * G
    sh, sw = stride
    ph, pw = padding
    oph, opw = output_padding
    dh, dw = dilation
    w_g = w.reshape(G, Cig, CogPerG, KH, KW)
    w_conv = jnp.flip(w_g, axis=(3, 4)).transpose(0, 2, 1, 3, 4).reshape(
        Cout, Cig, KH, KW)
    y = jax.lax.conv_general_dilated(
        x, w_conv, window_strides=(1, 1),
        padding=[(dh * (KH - 1) - ph, dh * (KH - 1) - ph + oph),
                 (dw * (KW - 1) - pw, dw * (KW - 1) - pw + opw)],
        lhs_dilation=(sh, sw), rhs_dilation=(dh, dw),
        dimension_numbers=("NCHW", "OIHW", "NCHW"),
        feature_group_count=G)
    if b is not None:
        y = y + b.reshape(1, -1, 1, 1)
    return y


# ------------------------------ model forward -------------------------------- #
@jax.jit
def model_forward(x, w0, w1, b1):
    x = conv_transpose2d(x, w0, None, stride=(2, 2), padding=(1, 1),
                         output_padding=(1, 1))
    x = conv_transpose2d(x, w1, b1, stride=(1, 2), padding=(2, 1),
                         dilation=(2, 1), groups=2)
    return x


def model_forward_ref(x, w0, w1, b1):
    x = _ref_conv_transpose2d(x, w0, None, stride=(2, 2), padding=(1, 1),
                              output_padding=(1, 1))
    x = _ref_conv_transpose2d(x, w1, b1, stride=(1, 2), padding=(2, 1),
                              dilation=(2, 1), groups=2)
    return x


if __name__ == "__main__":
    key = jax.random.PRNGKey(0)
    k1, k2, k3, k4 = jax.random.split(key, 4)
    # small shapes consistent with the module (groups=2 in the 2nd deconv)
    x = jax.random.normal(k1, (1, 6, 10, 10), jnp.float32)   # N, Cin, H, W
    w0 = jax.random.normal(k2, (6, 8, 3, 3), jnp.float32)    # (Cin, Cout, kH, kW)
    w1 = jax.random.normal(k3, (8, 2, 3, 3), jnp.float32)    # (Cin, Cout/groups, kH, kW)
    b1 = jax.random.normal(k4, (4,), jnp.float32)            # Cout of 2nd deconv

    y = model_forward(x, w0, w1, b1)
    jax.block_until_ready(y)

    y_ref = model_forward_ref(x, w0, w1, b1)
    assert y.shape == (1, 4, 20, 39), y.shape
    assert jnp.allclose(y, y_ref, atol=1e-3, rtol=1e-3), "mismatch vs reference"

    print("KERNEL_OK")
</pallas_src>

<mosaic_0001>
module attributes {stable_mosaic.version = 11 : i64} {
  func.func @_matmul_kernel(%arg0: i32, %arg1: memref<8x54xf32, #tpu.memory_space<vmem>>, %arg2: memref<54x512xf32, #tpu.memory_space<vmem>>, %arg3: memref<8x512xf32, #tpu.memory_space<vmem>>) attributes {dimension_semantics = [#tpu.dimension_semantics<arbitrary>], iteration_bounds = array<i64: 1>, scalar_prefetch = 0 : i64, scratch_operands = 0 : i64, tpu.core_type = #tpu.core_type<tc>, window_params = [{pipeline_mode = #tpu.pipeline_mode<synchronous>, transform_indices = @transform_0, window_bounds = array<i64: 8, 54>}, {pipeline_mode = #tpu.pipeline_mode<synchronous>, transform_indices = @transform_1, window_bounds = array<i64: 54, 512>}, {pipeline_mode = #tpu.pipeline_mode<synchronous>, transform_indices = @transform_2, window_bounds = array<i64: 8, 512>}]} {
    %c0 = arith.constant 0 : index
    %c0_0 = arith.constant 0 : index
    %0 = vector.load %arg1[%c0, %c0_0] : memref<8x54xf32, #tpu.memory_space<vmem>>, vector<8x54xf32>
    %c0_1 = arith.constant 0 : index
    %c0_2 = arith.constant 0 : index
    %1 = vector.load %arg2[%c0_1, %c0_2] : memref<54x512xf32, #tpu.memory_space<vmem>>, vector<54x512xf32>
    %cst = arith.constant dense<0.000000e+00> : vector<8x512xf32>
    %2 = tpu.matmul %0, %1, %cst {dimension_numbers = #tpu.dot_dimension_numbers<[1], [0], [0], [1], [0, 0, 1, 1], [], []>} : vector<8x54xf32>, vector<54x512xf32>, vector<8x512xf32> -> vector<8x512xf32>
    %c0_3 = arith.constant 0 : index
    %c0_4 = arith.constant 0 : index
    %3 = vector.load %arg3[%c0_3, %c0_4] : memref<8x512xf32, #tpu.memory_space<vmem>>, vector<8x512xf32>
    tpu.vector_store %arg3[%c0_3, %c0_4], %2 {strides = array<i32>} : memref<8x512xf32, #tpu.memory_space<vmem>>, vector<8x512xf32>,
    return
  }
  func.func @transform_0(%arg0: i32) -> (i32, i32) {
    %c0_i32 = arith.constant 0 : i32
    %c0_i32_0 = arith.constant 0 : i32
    %c0_i32_1 = arith.constant 0 : i32
    return %c0_i32, %c0_i32_0 : i32, i32
  }
  func.func @transform_1(%arg0: i32) -> (i32, i32) {
    %c0_i32 = arith.constant 0 : i32
    %c0_i32_0 = arith.constant 0 : i32
    %c0_i32_1 = arith.constant 0 : i32
    return %c0_i32, %c0_i32_0 : i32, i32
  }
  func.func @transform_2(%arg0: i32) -> (i32, i32) {
    %c0_i32 = arith.constant 0 : i32
    %c0_i32_0 = arith.constant 0 : i32
    %c0_i32_1 = arith.constant 0 : i32
    return %c0_i32, %c0_i32_0 : i32, i32
  }
}

module attributes {stable_mosaic.version = 11 : i64} {
  func.func @_matmul_bias_kernel(%arg0: i32, %arg1: memref<4x72xf32, #tpu.memory_space<vmem>>, %arg2: memref<72x896xf32, #tpu.memory_space<vmem>>, %arg3: memref<4x1xf32, #tpu.memory_space<vmem>>, %arg4: memref<4x896xf32, #tpu.memory_space<vmem>>) attributes {dimension_semantics = [#tpu.dimension_semantics<arbitrary>], iteration_bounds = array<i64: 1>, scalar_prefetch = 0 : i64, scratch_operands = 0 : i64, tpu.core_type = #tpu.core_type<tc>, window_params = [{pipeline_mode = #tpu.pipeline_mode<synchronous>, transform_indices = @transform_0, window_bounds = array<i64: 4, 72>}, {pipeline_mode = #tpu.pipeline_mode<synchronous>, transform_indices = @transform_1, window_bounds = array<i64: 72, 896>}, {pipeline_mode = #tpu.pipeline_mode<synchronous>, transform_indices = @transform_2, window_bounds = array<i64: 4, 1>}, {pipeline_mode = #tpu.pipeline_mode<synchronous>, transform_indices = @transform_3, window_bounds = array<i64: 4, 896>}]} {
    %c0 = arith.constant 0 : index
    %c0_0 = arith.constant 0 : index
    %0 = vector.load %arg1[%c0, %c0_0] : memref<4x72xf32, #tpu.memory_space<vmem>>, vector<4x72xf32>
    %c0_1 = arith.constant 0 : index
    %c0_2 = arith.constant 0 : index
    %1 = vector.load %arg2[%c0_1, %c0_2] : memref<72x896xf32, #tpu.memory_space<vmem>>, vector<72x896xf32>
    %cst = arith.constant dense<0.000000e+00> : vector<4x896xf32>
    %2 = tpu.matmul %0, %1, %cst {dimension_numbers = #tpu.dot_dimension_numbers<[1], [0], [0], [1], [0, 0, 1, 1], [], []>} : vector<4x72xf32>, vector<72x896xf32>, vector<4x896xf32> -> vector<4x896xf32>
    %c0_3 = arith.constant 0 : index
    %c0_4 = arith.constant 0 : index
    %3 = vector.load %arg3[%c0_3, %c0_4] : memref<4x1xf32, #tpu.memory_space<vmem>>, vector<4x1xf32>
    %4 = vector.broadcast %3 : vector<4x1xf32> to vector<4x896xf32>
    %5 = arith.addf %2, %4 : vector<4x896xf32>
    %c0_5 = arith.constant 0 : index
    %c0_6 = arith.constant 0 : index
    %6 = vector.load %arg4[%c0_5, %c0_6] : memref<4x896xf32, #tpu.memory_space<vmem>>, vector<4x896xf32>
    tpu.vector_store %arg4[%c0_5, %c0_6], %5 {strides = array<i32>} : memref<4x896xf32, #tpu.memory_space<vmem>>, vector<4x896xf32>,
    return
  }
  func.func @transform_0(%arg0: i32) -> (i32, i32) {
    %c0_i32 = arith.constant 0 : i32
    %c0_i32_0 = arith.constant 0 : i32
    %c0_i32_1 = arith.constant 0 : i32
    return %c0_i32, %c0_i32_0 : i32, i32
  }
  func.func @transform_1(%arg0: i32) -> (i32, i32) {
    %c0_i32 = arith.constant 0 : i32
    %c0_i32_0 = arith.constant 0 : i32
    %c0_i32_1 = arith.constant 0 : i32
    return %c0_i32, %c0_i32_0 : i32, i32
  }
  func.func @transform_2(%arg0: i32) -> (i32, i32) {
    %c0_i32 = arith.constant 0 : i32
    %c0_i32_0 = arith.constant 0 : i32
    %c0_i32_1 = arith.constant 0 : i32
    return %c0_i32, %c0_i32_0 : i32, i32
  }
  func.func @transform_3(%arg0: i32) -> (i32, i32) {
    %c0_i32 = arith.constant 0 : i32
    %c0_i32_0 = arith.constant 0 : i32
    %c0_i32_1 = arith.constant 0 : i32
    return %c0_i32, %c0_i32_0 : i32, i32
  }
}

</mosaic_0001>

<bundles_post_ra>
// kernel: mul.17
= control target key start
LH: loop header
LB: loop body
LE: loop exit
PB: predicated region body
PF: predicated region fallthrough
CT: control target
= control target key end

     0   :  { %vm83_vm0 = vcmask 1041409   ;;  %vm87_vm1 = vcmask 1042434   ;;  %vm91_vm2 = vcmask 1043459   ;;  %s370_s9 = smov 27   ;;  %s371_s10 = smov 30   ;;  %vm93_vm3 = vcmask 23552   ;;  %s480_s0 = inlined_call_operand.vmem [shape: f32[2,2,4,3,3], index: 0, kind: input, shape index: {}]   ;;  %s481_s1 = inlined_call_operand.vmem [shape: f32[2,2,36], index: 1, kind: output, shape index: {}]  }
   0x1   :  { %v342_v0 = vld [vmem:[%s480_s0 + $0x3c] sm:$0xf]  ;;  %v346_v1 = vld [vmem:[%s480_s0 + $0x2c] sm:$0xf]  ;;  %v343_v4 = vld [vmem:[%s480_s0 + $0x38] sm:$0xf] }
   0x2   :  { %v350_v2 = vld [vmem:[%s480_s0 + $0x1c] sm:$0xf]  ;;  %8 = vst [vmem:[#allocation1 + $0x78] sm:$0xf] %v342_v0  ;;  %28 = vst [vmem:[#allocation1 + $0x58] sm:$0xf] %v346_v1 }
   0x3   :  { %48 = vst [vmem:[#allocation1 + $0x38] sm:$0xf] %v350_v2  ;;  %v354_v3 = vld [vmem:[%s480_s0 + $0xc] sm:$0xf]  ;;  %v347_v5 = vld [vmem:[%s480_s0 + $0x28] sm:$0xf] }
   0x4   :  { %68 = vst [vmem:[#allocation1 + $0x18] sm:$0xf] %v354_v3  ;;  %13 = vst [vmem:[#allocation1 + $0x70] sm:$0xf] %v343_v4  ;;  %v351_v6 = vld [vmem:[%s480_s0 + $0x18] sm:$0xf] }
   0x5   :  { %33 = vst [vmem:[#allocation1 + $0x50] sm:$0xf] %v347_v5  ;;  %v355_v7 = vld [vmem:[%s480_s0 + $0x8] sm:$0xf]  ;;  %53 = vst [vmem:[#allocation1 + $0x30] sm:$0xf] %v351_v6 }
   0x6   :  { %73 = vst [vmem:[#allocation1 + $0x10] sm:$0xf] %v355_v7  ;;  %v344_v8 = vld [vmem:[%s480_s0 + $0x34] sm:$0xf]  ;;  %v348_v9 = vld [vmem:[%s480_s0 + $0x24] sm:$0xf] }
   0x7   :  { %18 = vst [vmem:[#allocation1 + $0x68] sm:$0xf] %v344_v8  ;;  %38 = vst [vmem:[#allocation1 + $0x48] sm:$0xf] %v348_v9  ;;  %v352_v10 = vld [vmem:[%s480_s0 + $0x14] sm:$0xf] }
   0x8   :  { %v356_v11 = vld [vmem:[%s480_s0 + $0x4] sm:$0xf]  ;;  %58 = vst [vmem:[#allocation1 + $0x28] sm:$0xf] %v352_v10  ;;  %v345_v12 = vld [vmem:[%s480_s0 + $0x30] sm:$0xf] }
   0x9   :  { %77 = vst [vmem:[#allocation1 + $0x8] sm:$0xf] %v356_v11  ;;  %v349_v13 = vld [vmem:[%s480_s0 + $0x20] sm:$0xf]  ;;  %v353_v14 = vld [vmem:[%s480_s0 + $0x10] sm:$0xf] }
   0xa   :  { %23 = vst [vmem:[#allocation1 + $0x60] sm:$0xf] %v345_v12  ;;  %43 = vst [vmem:[#allocation1 + $0x40] sm:$0xf] %v349_v13  ;;  %v78_v15 = vld [vmem:[%s480_s0] sm:$0xf] }
   0xb   :  { %63 = vst [vmem:[#allocation1 + $0x20] sm:$0xf] %v353_v14  ;;  %v100_v16 = vld [vmem:[#allocation1 + $0x39] sm:$0x2]   ;;  %79 = vst [vmem:[#allocation1] sm:$0xf] %v78_v15 }
   0xc   :  { %v104_v17 = vld [vmem:[#allocation1 + $0x58] sm:$0x4]   ;;  %v138_v20 = vld [vmem:[#allocation1 + $0x18] sm:$0x1]   ;;  %v118_v26 = vld [vmem:[#allocation1 + $0x19] sm:$0x1]  }
   0xd   :  { %v108_v18 = vld [vmem:[#allocation1 + $0x77] sm:$0x8]   ;;  %v140_v21 = vld [vmem:[#allocation1 + $0x37] sm:$0x2]   ;;  %v120_v29 = vld [vmem:[#allocation1 + $0x38] sm:$0x2]  }
   0xe   :  { %v98_v19 = vld [vmem:[#allocation1 + $0x1a] sm:$0x1]   ;;  %v142_v23 = vsel %vm83_vm0, %v140_v21, %v138_v20  ;;  %v144_v24 = vld [vmem:[#allocation1 + $0x56] sm:$0x4]   ;;  %v124_v30 = vld [vmem:[#allocation1 + $0x57] sm:$0x4]   ;;  %v122_v34 = vsel %vm83_vm0, %v120_v29, %v118_v26 }
   0xf   :  { %v102_v22 = vsel %vm83_vm0, %v100_v16, %v98_v19  ;;  %v148_v25 = vld [vmem:[#allocation1 + $0x75] sm:$0x8]   ;;  %v146_v28 = vsel %vm87_vm1, %v144_v24, %v142_v23  ;;  %v128_v31 = vld [vmem:[#allocation1 + $0x76] sm:$0x8]   ;;  %v158_v35 = vld [vmem:[#allocation1 + $0x12] sm:$0x1]   ;;  %v126_v38 = vsel %vm87_vm1, %v124_v30, %v122_v34 }
  0x10   :  { %v106_v27 = vsel %vm87_vm1, %v104_v17, %v102_v22  ;;  %v150_v33 = vsel %vm91_vm2, %v148_v25, %v146_v28  ;;  %v160_v36 = vld [vmem:[#allocation1 + $0x31] sm:$0x2]   ;;  %s369_s0 = smov 33   ;;  %v178_v41 = vld [vmem:[#allocation1 + $0x11] sm:$0x1]   ;;  %v130_v43 = vsel %vm91_vm2, %v128_v31, %v126_v38  ;;  %s372_s11 = smov 24  }
  0x11   :  { %v110_v32 = vsel %vm91_vm2, %v108_v18, %v106_v27  ;;  %v164_v37 = vld [vmem:[#allocation1 + $0x50] sm:$0x4]   ;;  %151 = vrot.lane.b32.xlu1 %v150_v33, %s370_s9  ;;  %v162_v39 = vsel %vm83_vm0, %v160_v36, %v158_v35  ;;  %v180_v42 = vld [vmem:[#allocation1 + $0x30] sm:$0x2]   ;;  %v198_v48 = vld [vmem:[#allocation1 + $0x10] sm:$0x1]  }
  0x12   :  { %111 = vrot.lane.b32.xlu0 %v110_v32, %s369_s0  ;;  %v168_v40 = vld [vmem:[#allocation1 + $0x6f] sm:$0x8]   ;;  %v166_v44 = vsel %vm87_vm1, %v164_v37, %v162_v39  ;;  %v182_v45 = vsel %vm83_vm0, %v180_v42, %v178_v41  ;;  %v184_v46 = vld [vmem:[#allocation1 + $0x4f] sm:$0x4]   ;;  %v200_v51 = vld [vmem:[#allocation1 + $0x2f] sm:$0x2]  }
  0x13   :  { %v188_v47 = vld [vmem:[#allocation1 + $0x6e] sm:$0x8]   ;;  %v170_v49 = vsel %vm91_vm2, %v168_v40, %v166_v44  ;;  %v186_v50 = vsel %vm87_vm1, %v184_v46, %v182_v45  ;;  %v204_v52 = vld [vmem:[#allocation1 + $0x4e] sm:$0x4]   ;;  %v202_v54 = vsel %vm83_vm0, %v200_v51, %v198_v48  ;;  %v218_v55 = vld [vmem:[#allocation1 + $0xa] sm:$0x1]  }
  0x14   :  { %v208_v53 = vld [vmem:[#allocation1 + $0x6d] sm:$0x8]   ;;  %v220_v56 = vld [vmem:[#allocation1 + $0x29] sm:$0x2]   ;;  %v206_v58 = vsel %vm87_vm1, %v204_v52, %v202_v54  ;;  %v238_v60 = vld [vmem:[#allocation1 + $0x9] sm:$0x1]   ;;  %v190_v62 = vsel %vm91_vm2, %v188_v47, %v186_v50 }
  0x15   :  { %v224_v57 = vld [vmem:[#allocation1 + $0x48] sm:$0x4]   ;;  %171 = vrot.lane.b32.xlu1 %v170_v49, %s372_s11  ;;  %v222_v59 = vsel %vm83_vm0, %v220_v56, %v218_v55  ;;  %v240_v61 = vld [vmem:[#allocation1 + $0x28] sm:$0x2]   ;;  %v210_v63 = vsel %vm91_vm2, %v208_v53, %v206_v58  ;;  %v258_v3 = vld [vmem:[#allocation1 + $0x8] sm:$0x1]  }
  0x16   :  { %131 = vrot.lane.b32.xlu0 %v130_v43, %s371_s10  ;;  %v228_v0 = vld [vmem:[#allocation1 + $0x67] sm:$0x8]   ;;  %v242_v1 = vsel %vm83_vm0, %v240_v61, %v238_v60  ;;  %v244_v2 = vld [vmem:[#allocation1 + $0x47] sm:$0x4]   ;;  %v226_v4 = vsel %vm87_vm1, %v224_v57, %v222_v59  ;;  %v260_v7 = vld [vmem:[#allocation1 + $0x27] sm:$0x2]  }
  0x17   :  { %v246_v5 = vsel %vm87_vm1, %v244_v2, %v242_v1  ;;  %v248_v6 = vld [vmem:[#allocation1 + $0x66] sm:$0x8]   ;;  %v264_v8 = vld [vmem:[#allocation1 + $0x46] sm:$0x4]   ;;  %v262_v9 = vsel %vm83_vm0, %v260_v7, %v258_v3  ;;  %v278_v10 = vld [vmem:[#allocation1 + $0x2] sm:$0x1]   ;;  %v230_v16 = vsel %vm91_vm2, %v228_v0, %v226_v4 }
  0x18   :  { %v280_v11 = vld [vmem:[#allocation1 + $0x21] sm:$0x2]   ;;  %s373_s12 = smov 21   ;;  %s374_s13 = smov 18   ;;  %v298_v14 = vld [vmem:[#allocation1 + $0x1] sm:$0x1]   ;;  %v250_v17 = vsel %vm91_vm2, %v248_v6, %v246_v5  ;;  %v266_v21 = vsel %vm87_vm1, %v264_v8, %v262_v9 }
  0x19   :  { %v284_v12 = vld [vmem:[#allocation1 + $0x40] sm:$0x4]   ;;  %211 = vrot.lane.b32.xlu1 %v210_v63, %s374_s13  ;;  %v282_v13 = vsel %vm83_vm0, %v280_v11, %v278_v10  ;;  %v300_v15 = vld [vmem:[#allocation1 + $0x20] sm:$0x2]   ;;  %v268_v18 = vld [vmem:[#allocation1 + $0x65] sm:$0x8]  }
  0x1a   :  { %191 = vrot.lane.b32.xlu0 %v190_v62, %s373_s12  ;;  %v288_v19 = vld [vmem:[#allocation1 + $0x5f] sm:$0x8]   ;;  %v80_v20 = vld [vmem:[#allocation1] sm:$0x1]   ;;  %v286_v22 = vsel %vm87_vm1, %v284_v12, %v282_v13  ;;  %v302_v26 = vsel %vm83_vm0, %v300_v15, %v298_v14  ;;  %v304_v27 = vld [vmem:[#allocation1 + $0x3f] sm:$0x4]   ;;  %v270_v30 = vsel %vm91_vm2, %v268_v18, %v266_v21 }
  0x1b   :  { %v82_v23 = vld [vmem:[#allocation1 + $0x1f] sm:$0x2]   ;;  %s375_s14 = smov 15   ;;  %s376_s15 = smov 12   ;;  %v290_v31 = vsel %vm91_vm2, %v288_v19, %v286_v22  ;;  %v306_v33 = vsel %vm87_vm1, %v304_v27, %v302_v26  ;;  %v308_v34 = vld [vmem:[#allocation1 + $0x5e] sm:$0x8]  }
  0x1c   :  { %v86_v24 = vld [vmem:[#allocation1 + $0x3e] sm:$0x4]   ;;  %v84_v28 = vsel %vm83_vm0, %v82_v23, %v80_v20  ;;  %s377_s16 = smov 9   ;;  %s378_s17 = smov 6   ;;  %v310_v35 = vsel %vm91_vm2, %v308_v34, %v306_v33  ;;  %vm113_vm4 = vcmask 294152   ;;  %vm133_vm5 = vcmask 269552  }
  0x1d   :  { %v90_v25 = vld [vmem:[#allocation1 + $0x5d] sm:$0x8]   ;;  %251 = vrot.lane.b32.xlu1 %v250_v17, %s376_s15  ;;  %v88_v29 = vsel %vm87_vm1, %v86_v24, %v84_v28  ;;  %s379_s18 = smov 3   ;;  %vm153_vm6 = vcmask 244952   ;;  %vm173_vm7 = vcmask 220352   ;;  %vm193_vm8 = vcmask 195752  }
  0x1e   :  { %231 = vrot.lane.b32.xlu0 %v230_v16, %s375_s14  ;;  %v92_v32 = vsel %vm91_vm2, %v90_v25, %v88_v29  ;;  %vm213_vm9 = vcmask 171152   ;;  %vm233_vm10 = vcmask 146552   ;;  %vm253_vm11 = vcmask 121952  }
  0x1f   :  { %94 = vst.msk [vmem:[#allocation0] sm:$0x3] %vm93_vm3, %v92_v32   ;;  %96 = vst.msk [vmem:[#allocation0 + $0x6] sm:$0xc] %vm93_vm3, %v92_v32   ;;  %vm273_vm12 = vcmask 97352   ;;  %vm293_vm13 = vcmask 72752  }
  0x20   :  { %vm313_vm14 = vcmask 48152  }
  0x21   :  { %291 = vrot.lane.b32.xlu1 %v290_v31, %s378_s17 }
  0x22   :  { %271 = vrot.lane.b32.xlu0 %v270_v30, %s377_s16 }
  0x26   :  { %311 = vrot.lane.b32.xlu0 %v310_v35, %s379_s18 }
  0x83   :  { %v152_v37 = vpop.permute.xlu1 %151  }
  0x84   :  { %v112_v36 = vpop.permute.xlu0 %111  }
  0x85   :  { %114 = vst.msk [vmem:[#allocation0] sm:$0x3] %vm113_vm4, %v112_v36   ;;  %116 = vst.msk [vmem:[#allocation0 + $0x6] sm:$0xc] %vm113_vm4, %v112_v36  }
  0x87   :  { %v172_v39 = vpop.permute.xlu1 %171  }
  0x88   :  { %v132_v38 = vpop.permute.xlu0 %131  }
  0x89   :  { %134 = vst.msk [vmem:[#allocation0] sm:$0x3] %vm133_vm5, %v132_v38   ;;  %136 = vst.msk [vmem:[#allocation0 + $0x6] sm:$0xc] %vm133_vm5, %v132_v38  }
  0x8a   :  { %154 = vst.msk [vmem:[#allocation0] sm:$0x3] %vm153_vm6, %v152_v37   ;;  %156 = vst.msk [vmem:[#allocation0 + $0x6] sm:$0xc] %vm153_vm6, %v152_v37  }
  0x8b   :  { %174 = vst.msk [vmem:[#allocation0] sm:$0x3] %vm173_vm7, %v172_v39   ;;  %176 = vst.msk [vmem:[#allocation0 + $0x6] sm:$0xc] %vm173_vm7, %v172_v39   ;;  %v212_v41 = vpop.permute.xlu1 %211  }
  0x8c   :  { %v192_v40 = vpop.permute.xlu0 %191  }
  0x8d   :  { %194 = vst.msk [vmem:[#allocation0] sm:$0x3] %vm193_vm8, %v192_v40   ;;  %196 = vst.msk [vmem:[#allocation0 + $0x6] sm:$0xc] %vm193_vm8, %v192_v40  }
  0x8e   :  { %214 = vst.msk [vmem:[#allocation0] sm:$0x3] %vm213_vm9, %v212_v41   ;;  %216 = vst.msk [vmem:[#allocation0 + $0x6] sm:$0xc] %vm213_vm9, %v212_v41  }
  0x8f   :  { %v252_v43 = vpop.permute.xlu1 %251  }
  0x90   :  { %v232_v42 = vpop.permute.xlu0 %231  }
  0x91   :  { %234 = vst.msk [vmem:[#allocation0] sm:$0x3] %vm233_vm10, %v232_v42   ;;  %236 = vst.msk [vmem:[#allocation0 + $0x6] sm:$0xc] %vm233_vm10, %v232_v42  }
  0x92   :  { %254 = vst.msk [vmem:[#allocation0] sm:$0x3] %vm253_vm11, %v252_v43   ;;  %256 = vst.msk [vmem:[#allocation0 + $0x6] sm:$0xc] %vm253_vm11, %v252_v43  }
  0x93   :  { %v292_v45 = vpop.permute.xlu1 %291  }
  0x94   :  { %v272_v44 = vpop.permute.xlu0 %271  }
  0x95   :  { %274 = vst.msk [vmem:[#allocation0] sm:$0x3] %vm273_vm12, %v272_v44   ;;  %276 = vst.msk [vmem:[#allocation0 + $0x6] sm:$0xc] %vm273_vm12, %v272_v44  }
  0x96   :  { %294 = vst.msk [vmem:[#allocation0] sm:$0x3] %vm293_vm13, %v292_v45   ;;  %296 = vst.msk [vmem:[#allocation0 + $0x6] sm:$0xc] %vm293_vm13, %v292_v45  }
  0x98   :  { %v312_v46 = vpop.permute.xlu0 %311  }
  0x99   :  { %314 = vst.msk [vmem:[#allocation0] sm:$0x3] %vm313_vm14, %v312_v46   ;;  %316 = vst.msk [vmem:[#allocation0 + $0x6] sm:$0xc] %vm313_vm14, %v312_v46  }
  0xa0   :  { %v320_v47 = vld [vmem:[#allocation0] sm:$0x3]  ;;  %v324_v48 = vld [vmem:[#allocation0 + $0x8] sm:$0x3] }
  0xa1   :  { %322 = vst [vmem:[%s481_s1] sm:$0x3] %v320_v47  ;;  %357 = vst [vmem:[%s481_s1 + $0x2] sm:$0x3] %v324_v48 }

// kernel: reverse
= control target key start
LH: loop header
LB: loop body
LE: loop exit
PB: predicated region body
PF: predicated region fallthrough
CT: control target
= control target key end

     0   :  { %v119_v18 = vld [vmem:[#allocation1 + $0x88] sm:$0xf]  ;;  %v129_v19 = vld [vmem:[#allocation1 + $0x80] sm:$0xf]  ;;  %v139_v20 = vld [vmem:[#allocation1 + $0x78] sm:$0xf]  ;;  %v297_v45 = vlaneseq  ;;  %s992_s0 = inlined_call_operand.vmem [shape: f32[6,8,3,3], index: 0, kind: input, shape index: {}]   ;;  %s993_s1 = inlined_call_operand.vmem [shape: f32[6,8,3,3], index: 1, kind: output, shape index: {}]  }
   0x1   :  { %v18_v0 = vld [vmem:[%s992_s0] sm:$0xf]  ;;  %v20_v1 = vld [vmem:[%s992_s0 + $0x4] sm:$0xf]  ;;  %v22_v2 = vld [vmem:[%s992_s0 + $0x8] sm:$0xf] }
   0x2   :  { %19 = vst [vmem:[#allocation1 + $0x4] sm:$0xf] %v18_v0  ;;  %21 = vst [vmem:[#allocation1 + $0xc] sm:$0xf] %v20_v1  ;;  %v24_v3 = vld [vmem:[%s992_s0 + $0xc] sm:$0xf] }
   0x3   :  { %23 = vst [vmem:[#allocation1 + $0x14] sm:$0xf] %v22_v2  ;;  %v26_v4 = vld [vmem:[%s992_s0 + $0x10] sm:$0xf]  ;;  %v28_v5 = vld [vmem:[%s992_s0 + $0x14] sm:$0xf] }
   0x4   :  { %25 = vst [vmem:[#allocation1 + $0x1c] sm:$0xf] %v24_v3  ;;  %27 = vst [vmem:[#allocation1 + $0x24] sm:$0xf] %v26_v4  ;;  %v30_v6 = vld [vmem:[%s992_s0 + $0x18] sm:$0xf] }
   0x5   :  { %29 = vst [vmem:[#allocation1 + $0x2c] sm:$0xf] %v28_v5  ;;  %v32_v7 = vld [vmem:[%s992_s0 + $0x1c] sm:$0xf]  ;;  %v34_v8 = vld [vmem:[%s992_s0 + $0x20] sm:$0xf] }
   0x6   :  { %31 = vst [vmem:[#allocation1 + $0x34] sm:$0xf] %v30_v6  ;;  %33 = vst [vmem:[#allocation1 + $0x3c] sm:$0xf] %v32_v7  ;;  %v36_v9 = vld [vmem:[%s992_s0 + $0x24] sm:$0xf] }
   0x7   :  { %35 = vst [vmem:[#allocation1 + $0x44] sm:$0xf] %v34_v8  ;;  %v38_v10 = vld [vmem:[%s992_s0 + $0x28] sm:$0xf]  ;;  %v40_v11 = vld [vmem:[%s992_s0 + $0x2c] sm:$0xf] }
   0x8   :  { %37 = vst [vmem:[#allocation1 + $0x4c] sm:$0xf] %v36_v9  ;;  %39 = vst [vmem:[#allocation1 + $0x54] sm:$0xf] %v38_v10  ;;  %v42_v12 = vld [vmem:[%s992_s0 + $0x30] sm:$0xf] }
   0x9   :  { %41 = vst [vmem:[#allocation1 + $0x5c] sm:$0xf] %v40_v11  ;;  %v44_v13 = vld [vmem:[%s992_s0 + $0x34] sm:$0xf]  ;;  %v46_v14 = vld [vmem:[%s992_s0 + $0x38] sm:$0xf] }
   0xa   :  { %43 = vst [vmem:[#allocation1 + $0x64] sm:$0xf] %v42_v12  ;;  %45 = vst [vmem:[#allocation1 + $0x6c] sm:$0xf] %v44_v13  ;;  %v48_v15 = vld [vmem:[%s992_s0 + $0x3c] sm:$0xf] }
   0xb   :  { %47 = vst [vmem:[#allocation1 + $0x74] sm:$0xf] %v46_v14  ;;  %v50_v16 = vld [vmem:[%s992_s0 + $0x40] sm:$0xf]  ;;  %v52_v17 = vld [vmem:[%s992_s0 + $0x44] sm:$0xf] }
   0xc   :  { %49 = vst [vmem:[#allocation1 + $0x7c] sm:$0xf] %v48_v15  ;;  %51 = vst [vmem:[#allocation1 + $0x84] sm:$0xf] %v50_v16  ;;  %v149_v21 = vld [vmem:[#allocation1 + $0x70] sm:$0xf] }
   0xd   :  { %53 = vst [vmem:[#allocation1 + $0x8c] sm:$0xf] %v52_v17  ;;  %121 = vst [vmem:[#allocation0 + $0x110] sm:$0xf] %v119_v18  ;;  %v159_v22 = vld [vmem:[#allocation1 + $0x68] sm:$0xf] }
   0xe   :  { %131 = vst [vmem:[#allocation0 + $0x100] sm:$0xf] %v129_v19  ;;  %141 = vst [vmem:[#allocation0 + $0xf0] sm:$0xf] %v139_v20  ;;  %v169_v23 = vld [vmem:[#allocation1 + $0x60] sm:$0xf] }
   0xf   :  { %151 = vst [vmem:[#allocation0 + $0xe0] sm:$0xf] %v149_v21  ;;  %161 = vst [vmem:[#allocation0 + $0xd0] sm:$0xf] %v159_v22  ;;  %v179_v24 = vld [vmem:[#allocation1 + $0x58] sm:$0xf] }
  0x10   :  { %171 = vst [vmem:[#allocation0 + $0xc0] sm:$0xf] %v169_v23  ;;  %v189_v25 = vld [vmem:[#allocation1 + $0x50] sm:$0xf]  ;;  %v199_v26 = vld [vmem:[#allocation1 + $0x48] sm:$0xf] }
  0x11   :  { %181 = vst [vmem:[#allocation0 + $0xb0] sm:$0xf] %v179_v24  ;;  %191 = vst [vmem:[#allocation0 + $0xa0] sm:$0xf] %v189_v25  ;;  %v209_v27 = vld [vmem:[#allocation1 + $0x40] sm:$0xf] }
  0x12   :  { %201 = vst [vmem:[#allocation0 + $0x90] sm:$0xf] %v199_v26  ;;  %v219_v28 = vld [vmem:[#allocation1 + $0x38] sm:$0xf]  ;;  %v229_v29 = vld [vmem:[#allocation1 + $0x30] sm:$0xf] }
  0x13   :  { %v204_v30 = vld [vmem:[#allocation1 + $0x44] sm:$0xf]  ;;  %211 = vst [vmem:[#allocation0 + $0x80] sm:$0xf] %v209_v27  ;;  %v214_v31 = vld [vmem:[#allocation1 + $0x3c] sm:$0xf] }
  0x14   :  { %221 = vst [vmem:[#allocation0 + $0x70] sm:$0xf] %v219_v28  ;;  %v224_v32 = vld [vmem:[#allocation1 + $0x34] sm:$0xf]  ;;  %231 = vst [vmem:[#allocation0 + $0x60] sm:$0xf] %v229_v29 }
  0x15   :  { %v174_v33 = vld [vmem:[#allocation1 + $0x5c] sm:$0xf]  ;;  %v184_v34 = vld [vmem:[#allocation1 + $0x54] sm:$0xf]  ;;  %v194_v35 = vld [vmem:[#allocation1 + $0x4c] sm:$0xf] }
  0x16   :  { %206 = vst [vmem:[#allocation0 + $0x88] sm:$0xf] %v204_v30  ;;  %216 = vst [vmem:[#allocation0 + $0x78] sm:$0xf] %v214_v31  ;;  %v144_v36 = vld [vmem:[#allocation1 + $0x74] sm:$0xf] }
  0x17   :  { %226 = vst [vmem:[#allocation0 + $0x68] sm:$0xf] %v224_v32  ;;  %v154_v37 = vld [vmem:[#allocation1 + $0x6c] sm:$0xf]  ;;  %v164_v38 = vld [vmem:[#allocation1 + $0x64] sm:$0xf] }
  0x18   :  { %176 = vst [vmem:[#allocation0 + $0xb8] sm:$0xf] %v174_v33  ;;  %186 = vst [vmem:[#allocation0 + $0xa8] sm:$0xf] %v184_v34  ;;  %v114_v39 = vld [vmem:[#allocation1 + $0x8c] sm:$0xf] }
  0x19   :  { %196 = vst [vmem:[#allocation0 + $0x98] sm:$0xf] %v194_v35  ;;  %v124_v40 = vld [vmem:[#allocation1 + $0x84] sm:$0xf]  ;;  %v134_v41 = vld [vmem:[#allocation1 + $0x7c] sm:$0xf] }
  0x1a   :  { %146 = vst [vmem:[#allocation0 + $0xe8] sm:$0xf] %v144_v36  ;;  %156 = vst [vmem:[#allocation0 + $0xd8] sm:$0xf] %v154_v37  ;;  %v234_v42 = vld [vmem:[#allocation1 + $0x2c] sm:$0xf] }
  0x1b   :  { %166 = vst [vmem:[#allocation0 + $0xc8] sm:$0xf] %v164_v38  ;;  %116 = vst [vmem:[#allocation0 + $0x118] sm:$0xf] %v114_v39  ;;  %v239_v43 = vld [vmem:[#allocation1 + $0x28] sm:$0xf] }
  0x1c   :  { %126 = vst [vmem:[#allocation0 + $0x108] sm:$0xf] %v124_v40  ;;  %136 = vst [vmem:[#allocation0 + $0xf8] sm:$0xf] %v134_v41  ;;  %v244_v44 = vld [vmem:[#allocation1 + $0x24] sm:$0xf] }
  0x1d   :  { %236 = vst [vmem:[#allocation0 + $0x58] sm:$0xf] %v234_v42  ;;  %241 = vst [vmem:[#allocation0 + $0x50] sm:$0xf] %v239_v43  ;;  %v249_v46 = vld [vmem:[#allocation1 + $0x20] sm:$0xf] }
  0x1e   :  { %246 = vst [vmem:[#allocation0 + $0x48] sm:$0xf] %v244_v44  ;;  %v254_v47 = vld [vmem:[#allocation1 + $0x1c] sm:$0xf]  ;;  %v259_v48 = vld [vmem:[#allocation1 + $0x18] sm:$0xf] }
  0x1f   :  { %251 = vst [vmem:[#allocation0 + $0x40] sm:$0xf] %v249_v46  ;;  %256 = vst [vmem:[#allocation0 + $0x38] sm:$0xf] %v254_v47  ;;  %v264_v49 = vld [vmem:[#allocation1 + $0x14] sm:$0xf] }
  0x20   :  { %261 = vst [vmem:[#allocation0 + $0x30] sm:$0xf] %v259_v48  ;;  %v269_v50 = vld [vmem:[#allocation1 + $0x10] sm:$0xf]  ;;  %v274_v51 = vld [vmem:[#allocation1 + $0xc] sm:$0xf] }
  0x21   :  { %266 = vst [vmem:[#allocation0 + $0x28] sm:$0xf] %v264_v49  ;;  %271 = vst [vmem:[#allocation0 + $0x20] sm:$0xf] %v269_v50  ;;  %v279_v52 = vld [vmem:[#allocation1 + $0x8] sm:$0xf] }
  0x22   :  { %276 = vst [vmem:[#allocation0 + $0x18] sm:$0xf] %v274_v51  ;;  %v283_v53 = vld [vmem:[#allocation1 + $0x4] sm:$0xf]  ;;  %v286_v54 = vld [vmem:[#allocation1] sm:$0xf] }
  0x23   :  { %281 = vst [vmem:[#allocation0 + $0x10] sm:$0xf] %v279_v52  ;;  %285 = vst [vmem:[#allocation0 + $0x8] sm:$0xf] %v283_v53  ;;  %v926_v55 = vshrl.u32 %v297_v45, 7 }
  0x24   :  { %287 = vst [vmem:[#allocation0] sm:$0xf] %v286_v54  ;;  %v373_v56 = vld [vmem:[#allocation0 + $0x87] ss:$-1 sm:$0xff]  ;;  %v378_v57 = vld [vmem:[#allocation0 + $0x8f] ss:$-1 sm:$0xff] }
  0x25   :  { %v374_v58 = vrot.slane %v373_v56, 5  ;;  %v379_v59 = vrot.slane %v378_v57, 5  ;;  %v387_v60 = vld [vmem:[#allocation0 + $0x77] ss:$-1 sm:$0xff]  ;;  %v392_v61 = vld [vmem:[#allocation0 + $0x7f] ss:$-1 sm:$0xff] }
  0x26   :  { %vm299_vm0 = vcmp.lt.s32.totalorder %v926_v55, 3  ;;  %v388_v62 = vrot.slane %v387_v60, 5  ;;  %v393_v63 = vrot.slane %v392_v61, 5  ;;  %v401_v0 = vld [vmem:[#allocation0 + $0x67] ss:$-1 sm:$0xff] }
  0x27   :  { %375 = vst [vmem:[#allocation2 + $0x30] sm:$0xff] %v374_v58  ;;  %v402_v1 = vrot.slane %v401_v0, 5  ;;  %v406_v2 = vld [vmem:[#allocation0 + $0x6f] ss:$-1 sm:$0xff]  ;;  %v415_v3 = vld [vmem:[#allocation0 + $0xb7] ss:$-1 sm:$0xff] }
  0x28   :  { %v331_v4 = vld [vmem:[#allocation0 + $0x57] ss:$-1 sm:$0xff]  ;;  %v336_v5 = vld [vmem:[#allocation0 + $0x5f] ss:$-1 sm:$0xff]  ;;  %v350_v6 = vld [vmem:[#allocation0 + $0x4f] ss:$-1 sm:$0xff] }
  0x29   :  { %383 = vst.msk [vmem:[#allocation2 + $0x30] sm:$0xff] %vm299_vm0, %v379_v59  ;;  %389 = vst [vmem:[#allocation2 + $0x38] sm:$0xff] %v388_v62  ;;  %v332_v7 = vrot.slane %v331_v4, 5  ;;  %v337_v8 = vrot.slane %v336_v5, 5  ;;  %v345_v9 = vld [vmem:[#allocation0 + $0x47] ss:$-1 sm:$0xff] }
  0x2a   :  { %v351_v10 = vrot.slane %v350_v6, 5  ;;  %397 = vst.msk [vmem:[#allocation2 + $0x38] sm:$0xff] %vm299_vm0, %v393_v63  ;;  %403 = vst [vmem:[#allocation2 + $0x40] sm:$0xff] %v402_v1  ;;  %v407_v11 = vrot.slane %v406_v2, 5  ;;  %v290_v12 = vld [vmem:[#allocation0 + $0x27] ss:$-1 sm:$0xff] }
  0x2b   :  { %v295_v13 = vld [vmem:[#allocation0 + $0x2f] ss:$-1 sm:$0xff]  ;;  %v309_v14 = vld [vmem:[#allocation0 + $0x1f] ss:$-1 sm:$0xff]  ;;  %v291_v15 = vrot.slane %v290_v12, 5  ;;  %333 = vst [vmem:[#allocation2 + $0x18] sm:$0xff] %v332_v7 }
  0x2c   :  { %v296_v16 = vrot.slane %v295_v13, 5  ;;  %v304_v17 = vld [vmem:[#allocation0 + $0x17] ss:$-1 sm:$0xff]  ;;  %v310_v18 = vrot.slane %v309_v14, 5  ;;  %v346_v19 = vrot.slane %v345_v9, 5  ;;  %411 = vst.msk [vmem:[#allocation2 + $0x40] sm:$0xff] %vm299_vm0, %v407_v11 }
  0x2d   :  { %v305_v20 = vrot.slane %v304_v17, 5  ;;  %v317_v21 = vld [vmem:[#allocation0 + $0x7] ss:$-1 sm:$0xff]  ;;  %v322_v22 = vld [vmem:[#allocation0 + $0xf] ss:$-1 sm:$0xff]  ;;  %341 = vst.msk [vmem:[#allocation2 + $0x18] sm:$0xff] %vm299_vm0, %v337_v8 }
  0x2e   :  { %v416_v23 = vrot.slane %v415_v3, 5  ;;  %292 = vst [vmem:[#allocation2] sm:$0xff] %v291_v15  ;;  %v318_v24 = vrot.slane %v317_v21, 5  ;;  %v323_v25 = vrot.slane %v322_v22, 5  ;;  %347 = vst [vmem:[#allocation2 + $0x20] sm:$0xff] %v346_v19 }
  0x2f   :  { %v359_v26 = vld [vmem:[#allocation0 + $0x37] ss:$-1 sm:$0xff]  ;;  %v364_v27 = vld [vmem:[#allocation0 + $0x3f] ss:$-1 sm:$0xff]  ;;  %300 = vst.msk [vmem:[#allocation2] sm:$0xff] %vm299_vm0, %v296_v16  ;;  %306 = vst [vmem:[#allocation2 + $0x8] sm:$0xff] %v305_v20 }
  0x30   :  { %355 = vst.msk [vmem:[#allocation2 + $0x20] sm:$0xff] %vm299_vm0, %v351_v10  ;;  %v360_v28 = vrot.slane %v359_v26, 5  ;;  %v365_v29 = vrot.slane %v364_v27, 5  ;;  %417 = vst [vmem:[#allocation2 + $0x48] sm:$0xff] %v416_v23  ;;  %v420_v30 = vld [vmem:[#allocation0 + $0xbf] ss:$-1 sm:$0xff] }
  0x31   :  { %v429_v31 = vld [vmem:[#allocation0 + $0xa7] ss:$-1 sm:$0xff]  ;;  %314 = vst.msk [vmem:[#allocation2 + $0x8] sm:$0xff] %vm299_vm0, %v310_v18  ;;  %319 = vst [vmem:[#allocation2 + $0x10] sm:$0xff] %v318_v24  ;;  %v421_v32 = vrot.slane %v420_v30, 5 }
  0x32   :  { %v430_v33 = vrot.slane %v429_v31, 5  ;;  %v434_v34 = vld [vmem:[#allocation0 + $0xaf] ss:$-1 sm:$0xff]  ;;  %v443_v35 = vld [vmem:[#allocation0 + $0x97] ss:$-1 sm:$0xff]  ;;  %327 = vst.msk [vmem:[#allocation2 + $0x10] sm:$0xff] %vm299_vm0, %v323_v25 }
  0x33   :  { %361 = vst [vmem:[#allocation2 + $0x28] sm:$0xff] %v360_v28  ;;  %v435_v36 = vrot.slane %v434_v34, 5  ;;  %v444_v37 = vrot.slane %v443_v35, 5  ;;  %v448_v38 = vld [vmem:[#allocation0 + $0x9f] ss:$-1 sm:$0xff]  ;;  %425 = vst.msk [vmem:[#allocation2 + $0x48] sm:$0xff] %vm299_vm0, %v421_v32 }
  0x34   :  { %v457_v39 = vld [vmem:[#allocation0 + $0xe7] ss:$-1 sm:$0xff]  ;;  %369 = vst.msk [vmem:[#allocation2 + $0x28] sm:$0xff] %vm299_vm0, %v365_v29  ;;  %431 = vst [vmem:[#allocation2 + $0x50] sm:$0xff] %v430_v33  ;;  %v449_v40 = vrot.slane %v448_v38, 5 }
  0x35   :  { %v458_v41 = vrot.slane %v457_v39, 5  ;;  %v462_v42 = vld [vmem:[#allocation0 + $0xef] ss:$-1 sm:$0xff]  ;;  %v471_v43 = vld [vmem:[#allocation0 + $0xd7] ss:$-1 sm:$0xff]  ;;  %439 = vst.msk [vmem:[#allocation2 + $0x50] sm:$0xff] %vm299_vm0, %v435_v36 }
  0x36   :  { %445 = vst [vmem:[#allocation2 + $0x58] sm:$0xff] %v444_v37  ;;  %v463_v44 = vrot.slane %v462_v42, 5  ;;  %v472_v45 = vrot.slane %v471_v43, 5  ;;  %v476_v46 = vld [vmem:[#allocation0 + $0xdf] ss:$-1 sm:$0xff] }
  0x37   :  { %v485_v47 = vld [vmem:[#allocation0 + $0xc7] ss:$-1 sm:$0xff]  ;;  %453 = vst.msk [vmem:[#allocation2 + $0x58] sm:$0xff] %vm299_vm0, %v449_v40  ;;  %459 = vst [vmem:[#allocation2 + $0x60] sm:$0xff] %v458_v41  ;;  %v477_v48 = vrot.slane %v476_v46, 5 }
  0x38   :  { %v486_v49 = vrot.slane %v485_v47, 5  ;;  %v490_v50 = vld [vmem:[#allocation0 + $0xcf] ss:$-1 sm:$0xff]  ;;  %v499_v51 = vld [vmem:[#allocation0 + $0x117] ss:$-1 sm:$0xff]  ;;  %467 = vst.msk [vmem:[#allocation2 + $0x60] sm:$0xff] %vm299_vm0, %v463_v44 }
  0x39   :  { %473 = vst [vmem:[#allocation2 + $0x68] sm:$0xff] %v472_v45  ;;  %v491_v52 = vrot.slane %v490_v50, 5  ;;  %v500_v53 = vrot.slane %v499_v51, 5  ;;  %v504_v54 = vld [vmem:[#allocation0 + $0x11f] ss:$-1 sm:$0xff] }
  0x3a   :  { %v513_v56 = vld [vmem:[#allocation0 + $0x107] ss:$-1 sm:$0xff]  ;;  %481 = vst.msk [vmem:[#allocation2 + $0x68] sm:$0xff] %vm299_vm0, %v477_v48  ;;  %487 = vst [vmem:[#allocation2 + $0x70] sm:$0xff] %v486_v49  ;;  %v505_v57 = vrot.slane %v504_v54, 5 }
  0x3b   :  { %v514_v58 = vrot.slane %v513_v56, 5  ;;  %v518_v59 = vld [vmem:[#allocation0 + $0x10f] ss:$-1 sm:$0xff]  ;;  %v527_v60 = vld [vmem:[#allocation0 + $0xf7] ss:$-1 sm:$0xff]  ;;  %495 = vst.msk [vmem:[#allocation2 + $0x70] sm:$0xff] %vm299_vm0, %v491_v52 }
  0x3c   :  { %501 = vst [vmem:[#allocation2 + $0x78] sm:$0xff] %v500_v53  ;;  %v519_v61 = vrot.slane %v518_v59, 5  ;;  %v528_v62 = vrot.slane %v527_v60, 5  ;;  %v532_v63 = vld [vmem:[#allocation0 + $0xff] ss:$-1 sm:$0xff] }
  0x3d   :  { %v541_v0 = vld [vmem:[#allocation2] sm:$0xf]  ;;  %509 = vst.msk [vmem:[#allocation2 + $0x78] sm:$0xff] %vm299_vm0, %v505_v57  ;;  %515 = vst [vmem:[#allocation2 + $0x80] sm:$0xff] %v514_v58  ;;  %v533_v1 = vrot.slane %v532_v63, 5 }
  0x3e   :  { %543 = vst [vmem:[#allocation3] sm:$0xf] %v541_v0  ;;  %v545_v2 = vld [vmem:[#allocation2 + $0x8] sm:$0xf]  ;;  %v550_v3 = vld [vmem:[#allocation2 + $0x10] sm:$0xf] }
  0x3f   :  { %523 = vst.msk [vmem:[#allocation2 + $0x80] sm:$0xff] %vm299_vm0, %v519_v61  ;;  %529 = vst [vmem:[#allocation2 + $0x88] sm:$0xff] %v528_v62  ;;  %v556_v4 = vld [vmem:[#allocation2 + $0x18] sm:$0xf]  ;;  %v562_v5 = vld [vmem:[#allocation2 + $0x20] sm:$0xf] }
  0x40   :  { %548 = vst [vmem:[#allocation3 + $0x4] sm:$0xf] %v545_v2  ;;  %554 = vst [vmem:[#allocation3 + $0x8] sm:$0xf] %v550_v3  ;;  %v568_v6 = vld [vmem:[#allocation2 + $0x28] sm:$0xf] }
  0x41   :  { %537 = vst.msk [vmem:[#allocation2 + $0x88] sm:$0xff] %vm299_vm0, %v533_v1  ;;  %560 = vst [vmem:[#allocation3 + $0xc] sm:$0xf] %v556_v4  ;;  %v574_v55 = vld [vmem:[#allocation2 + $0x30] sm:$0xf] }
  0x42   :  { %566 = vst [vmem:[#allocation3 + $0x10] sm:$0xf] %v562_v5  ;;  %572 = vst [vmem:[#allocation3 + $0x14] sm:$0xf] %v568_v6  ;;  %v580_v7 = vld [vmem:[#allocation2 + $0x38] sm:$0xf] }
  0x43   :  { %v586_v8 = vld [vmem:[#allocation2 + $0x40] sm:$0xf]  ;;  %578 = vst [vmem:[#allocation3 + $0x18] sm:$0xf] %v574_v55  ;;  %584 = vst [vmem:[#allocation3 + $0x1c] sm:$0xf] %v580_v7 }
  0x44   :  { %590 = vst [vmem:[#allocation3 + $0x20] sm:$0xf] %v586_v8  ;;  %v592_v9 = vld [vmem:[#allocation2 + $0x48] sm:$0xf]  ;;  %v598_v10 = vld [vmem:[#allocation2 + $0x50] sm:$0xf] }
  0x45   :  { %v604_v11 = vld [vmem:[#allocation2 + $0x58] sm:$0xf]  ;;  %596 = vst [vmem:[#allocation3 + $0x24] sm:$0xf] %v592_v9  ;;  %602 = vst [vmem:[#allocation3 + $0x28] sm:$0xf] %v598_v10 }
  0x46   :  { %608 = vst [vmem:[#allocation3 + $0x2c] sm:$0xf] %v604_v11  ;;  %v610_v12 = vld [vmem:[#allocation2 + $0x60] sm:$0xf]  ;;  %v616_v13 = vld [vmem:[#allocation2 + $0x68] sm:$0xf] }
  0x47   :  { %614 = vst [vmem:[#allocation3 + $0x30] sm:$0xf] %v610_v12  ;;  %620 = vst [vmem:[#allocation3 + $0x34] sm:$0xf] %v616_v13  ;;  %v622_v14 = vld [vmem:[#allocation2 + $0x70] sm:$0xf] }
  0x48   :  { %626 = vst [vmem:[#allocation3 + $0x38] sm:$0xf] %v622_v14  ;;  %v628_v15 = vld [vmem:[#allocation2 + $0x78] sm:$0xf]  ;;  %v634_v16 = vld [vmem:[#allocation2 + $0x80] sm:$0xf] }
  0x49   :  { %632 = vst [vmem:[#allocation3 + $0x3c] sm:$0xf] %v628_v15  ;;  %v660_v17 = vld [vmem:[#allocation3] sm:$0xff]   ;;  %638 = vst [vmem:[#allocation3 + $0x40] sm:$0xf] %v634_v16  ;;  %v664_v19 = vld [vmem:[#allocation3 + $0x8] sm:$0xff]  }
  0x4a   :  { %v640_v18 = vld [vmem:[#allocation2 + $0x88] sm:$0xf]  ;;  %661 = vst [vmem:[%s993_s1] sm:$0xff] %v660_v17   ;;  %v668_v20 = vld [vmem:[#allocation3 + $0x10] sm:$0xff]   ;;  %665 = vst [vmem:[%s993_s1 + $0x8] sm:$0xff] %v664_v19  }
  0x4b   :  { %644 = vst [vmem:[#allocation3 + $0x44] sm:$0xf] %v640_v18  ;;  %669 = vst [vmem:[%s993_s1 + $0x10] sm:$0xff] %v668_v20   ;;  %v672_v21 = vld [vmem:[#allocation3 + $0x18] sm:$0xff]  }
  0x4c   :  { %673 = vst [vmem:[%s993_s1 + $0x18] sm:$0xff] %v672_v21   ;;  %v676_v22 = vld [vmem:[#allocation3 + $0x20] sm:$0xff]  }
  0x4d   :  { %v680_v23 = vld [vmem:[#allocation3 + $0x28] sm:$0xff]   ;;  %677 = vst [vmem:[%s993_s1 + $0x20] sm:$0xff] %v676_v22  }
  0x4e   :  { %681 = vst [vmem:[%s993_s1 + $0x28] sm:$0xff] %v680_v23   ;;  %v684_v24 = vld [vmem:[#allocation3 + $0x30] sm:$0xff]  }
  0x4f   :  { %685 = vst [vmem:[%s993_s1 + $0x30] sm:$0xff] %v684_v24  }
  0x50   :  { %v688_v25 = vld [vmem:[#allocation3 + $0x38] sm:$0xff]  }
  0x51   :  { %689 = vst [vmem:[%s993_s1 + $0x38] sm:$0xff] %v688_v25  }
  0x52   :  { %v692_v26 = vld [vmem:[#allocation3 + $0x40] sm:$0xff]  }
  0x53   :  { %693 = vst [vmem:[%s993_s1 + $0x40] sm:$0xff] %v692_v26  }

// kernel: model_forward.2
= control target key start
LH: loop header
LB: loop body
LE: loop exit
PB: predicated region body
PF: predicated region fallthrough
CT: control target
= control target key end

     0   :  { %v238_v3 = vmov 0.0   ;;  %vm44_vm0 = vcmask 1045504   ;;  %vm40_vm1 = vcmask 441344   ;;  %s353_s1 = inlined_call_operand.vmem [shape: f32[54,512], index: 1, kind: input, shape index: {}]   ;;  %s354_s0 = inlined_call_operand.vmem [shape: f32[8,54], index: 0, kind: input, shape index: {}]   ;;  %s355_s2 = inlined_call_operand.vmem [shape: f32[8,512], index: 2, kind: output, shape index: {}]  }
   0x1   :  { %v13_v0 = vld [vmem:[%s353_s1 + $0x8] sm:$0xff]  ;;  %v15_v2 = vld [vmem:[%s353_s1 + $0x18] sm:$0xff]  ;;  %121 = vmatprep.mubr.f32.mxu0 %v238_v3  ;;  %192 = vmatprep.mubr.f32.mxu1 %v238_v3  ;;  %v12_v6 = vld [vmem:[%s353_s1] sm:$0xff] }
   0x2   :  { %v17_v1 = vld [vmem:[%s353_s1 + $0x28] sm:$0xff]  ;;  %v19_v5 = vld [vmem:[%s353_s1 + $0x38] sm:$0xff]  ;;  %v16_v7 = vld [vmem:[%s353_s1 + $0x20] sm:$0xff] }
   0x3   :  { %v213_v4 = vpack.c.bf16 %v17_v1, %v13_v0  ;;  %v225_v8 = vpack.c.bf16 %v19_v5, %v15_v2  ;;  %v215_v9 = vpack.c.bf16 %v16_v7, %v12_v6  ;;  %v14_v10 = vld [vmem:[%s353_s1 + $0x10] sm:$0xff]  ;;  %v21_v12 = vld [vmem:[%s353_s1 + $0x48] sm:$0xff]  ;;  %v23_v15 = vld [vmem:[%s353_s1 + $0x58] sm:$0xff] }
   0x4   :  { %v18_v11 = vld [vmem:[%s353_s1 + $0x30] sm:$0xff]  ;;  %v25_v14 = vld [vmem:[%s353_s1 + $0x68] sm:$0xff]  ;;  %v27_v16 = vld [vmem:[%s353_s1 + $0x78] sm:$0xff] }
   0x5   :  { %214 = vmatprep.subr.bf16.mxu0 %v213_v4  ;;  %v227_v13 = vpack.c.bf16 %v18_v11, %v14_v10  ;;  %226 = vmatprep.subr.bf16.mxu1 %v225_v8  ;;  %v217_v17 = vpack.c.bf16 %v25_v14, %v21_v12  ;;  %v229_v18 = vpack.c.bf16 %v27_v16, %v23_v15  ;;  %v20_v19 = vld [vmem:[%s353_s1 + $0x40] sm:$0xff]  ;;  %v22_v21 = vld [vmem:[%s353_s1 + $0x50] sm:$0xff]  ;;  %v29_v24 = vld [vmem:[%s353_s1 + $0x88] sm:$0xff] }
   0x6   :  { %216 = vmatpush1.bf16.msra.mxu0 %v215_v9  ;;  %v24_v20 = vld [vmem:[%s353_s1 + $0x60] sm:$0xff]  ;;  %v26_v23 = vld [vmem:[%s353_s1 + $0x70] sm:$0xff]  ;;  %v33_v25 = vld [vmem:[%s353_s1 + $0xa8] sm:$0xff] }
   0x7   :  { %228 = vmatpush1.bf16.msra.mxu1 %v227_v13  ;;  %v219_v22 = vpack.c.bf16 %v24_v20, %v20_v19  ;;  %218 = vmatprep.subr.bf16.mxu0 %v217_v17  ;;  %v231_v26 = vpack.c.bf16 %v26_v23, %v22_v21  ;;  %v221_v27 = vpack.c.bf16 %v33_v25, %v29_v24  ;;  %v31_v28 = vld [vmem:[%s353_s1 + $0x98] sm:$0xff]  ;;  %v28_v30 = vld [vmem:[%s353_s1 + $0x80] sm:$0xff]  ;;  %v30_v33 = vld [vmem:[%s353_s1 + $0x90] sm:$0xff] }
   0x8   :  { %230 = vmatprep.subr.bf16.mxu1 %v229_v18  ;;  %v35_v29 = vld [vmem:[%s353_s1 + $0xb8] sm:$0xff]  ;;  %v32_v32 = vld [vmem:[%s353_s1 + $0xa0] sm:$0xff]  ;;  %v34_v34 = vld [vmem:[%s353_s1 + $0xb0] sm:$0xff] }
   0x9   :  { %v233_v31 = vpack.c.bf16 %v35_v29, %v31_v28  ;;  %v223_v35 = vpack.c.bf16 %v32_v32, %v28_v30  ;;  %v235_v36 = vpack.c.bf16 %v34_v34, %v30_v33  ;;  %v37_v37 = vld [vmem:[%s353_s1 + $0xc8] sm:$0x3f]  ;;  %v39_v38 = vld [vmem:[%s353_s1 + $0xd8] sm:$0x3f]  ;;  %v36_v39 = vld [vmem:[%s353_s1 + $0xc0] sm:$0x3f] }
   0xa   :  { %220 = vmatpush1.bf16.msra.mxu0 %v219_v22  ;;  %v38_v40 = vld [vmem:[%s353_s1 + $0xd0] sm:$0x3f]  ;;  %v11_v41 = vld [vmem:[%s354_s0] sm:$0xff] }
   0xb   :  { %232 = vmatpush1.bf16.msra.mxu1 %v231_v26  ;;  %222 = vmatprep.subr.bf16.mxu0 %v221_v27 }
   0xc   :  { %234 = vmatprep.subr.bf16.mxu1 %v233_v31 }
   0xe   :  { %224 = vmatpush1.bf16.msra.mxu0 %v223_v35 }
   0xf   :  { %236 = vmatpush1.bf16.msra.mxu1 %v235_v36  ;;  %207 = vmatprep.subr.msk.mxu0 %vm44_vm0, %v37_v37 }
  0x10   :  { %210 = vmatprep.subr.msk.mxu1 %vm44_vm0, %v39_v38 }
  0x12   :  { %208 = vmatpush1.msk.msra.mxu0 %vm44_vm0, %v36_v39 }
  0x13   :  { %211 = vmatpush1.msk.msra.mxu1 %vm44_vm0, %v38_v40  ;;  %209 = vmatmul.mubr.msk.f32.vlgmr.msra.gmra.mrb[0].mxu0 %vm40_vm1, %v11_v41 }
  0x14   :  { %212 = vmatmul.mubr.msk.f32.vlgmr.msra.gmra.mrb[0].mxu1 %vm40_vm1, %v11_v41 }
  0xe6   :  { %v123_v42 = vpop.f32.mrb[0].mxu0 }
  0xe7   :  { %199 = vst [vmem:[%s355_s2] sm:$0xff] %v123_v42  ;;  %v194_v43 = vpop.f32.mrb[0].mxu1  ;;  %v125_v44 = vpop.f32.mrb[1].mxu0 }
  0xe8   :  { %201 = vst [vmem:[%s355_s2 + $0x10] sm:$0xff] %v194_v43  ;;  %200 = vst [vmem:[%s355_s2 + $0x8] sm:$0xff] %v125_v44  ;;  %v196_v45 = vpop.f32.mrb[1].mxu1 }
  0xe9   :  { %202 = vst [vmem:[%s355_s2 + $0x18] sm:$0xff] %v196_v45 }

// kernel: model_forward.3
= control target key start
LH: loop header
LB: loop body
LE: loop exit
PB: predicated region body
PF: predicated region fallthrough
CT: control target
= control target key end

     0   :  { %v491_v3 = vmov 0.0   ;;  %v492_v8 = vmov 0   ;;  %vm84_vm0 = vcmask 588800   ;;  %vm494_vm1 = vmmov 0   ;;  %s737_s1 = inlined_call_operand.vmem [shape: f32[72,896], index: 1, kind: input, shape index: {}]   ;;  %s738_s0 = inlined_call_operand.vmem [shape: f32[4,72], index: 0, kind: input, shape index: {}]   ;;  %s739_s2 = inlined_call_operand.vmem [shape: f32[4,1], index: 2, kind: input, shape index: {}]   ;;  %s740_s3 = inlined_call_operand.vmem [shape: f32[4,896], index: 3, kind: output, shape index: {}]  }
   0x1   :  { %v16_v0 = vld [vmem:[%s737_s1 + $0x8] sm:$0xff]  ;;  %v23_v1 = vld [vmem:[%s737_s1 + $0x40] sm:$0xff]  ;;  %152 = vmatprep.mubr.f32.mxu0 %v491_v3  ;;  %223 = vmatprep.mubr.f32.mxu1 %v491_v3  ;;  %v22_v5 = vld [vmem:[%s737_s1 + $0x38] sm:$0xff] }
   0x2   :  { %v15_v2 = vld [vmem:[%s737_s1] sm:$0xff]  ;;  %v426_v4 = vpack.c.bf16 %v23_v1, %v16_v0  ;;  %v18_v6 = vld [vmem:[%s737_s1 + $0x18] sm:$0xff]  ;;  %v25_v7 = vld [vmem:[%s737_s1 + $0x50] sm:$0xff]  ;;  %490 = vset.pattern.permute.xlu0 %v492_v8 }
   0x3   :  { %v428_v9 = vpack.c.bf16 %v22_v5, %v15_v2  ;;  %v442_v10 = vpack.c.bf16 %v25_v7, %v18_v6  ;;  %v17_v11 = vld [vmem:[%s737_s1 + $0x10] sm:$0xff]  ;;  %v24_v12 = vld [vmem:[%s737_s1 + $0x48] sm:$0xff]  ;;  %v30_v13 = vld [vmem:[%s737_s1 + $0x78] sm:$0xff] }
   0x4   :  { %427 = vmatprep.subr.bf16.mxu0 %v426_v4  ;;  %v444_v14 = vpack.c.bf16 %v24_v12, %v17_v11  ;;  %v37_v15 = vld [vmem:[%s737_s1 + $0xb0] sm:$0xff]  ;;  %v36_v17 = vld [vmem:[%s737_s1 + $0xa8] sm:$0xff]  ;;  %v39_v21 = vld [vmem:[%s737_s1 + $0xc0] sm:$0xff] }
   0x5   :  { %v29_v16 = vld [vmem:[%s737_s1 + $0x70] sm:$0xff]  ;;  %429 = vmatpush1.bf16.msra.mxu0 %v428_v9  ;;  %443 = vmatprep.subr.bf16.mxu1 %v442_v10  ;;  %v430_v18 = vpack.c.bf16 %v37_v15, %v30_v13  ;;  %v32_v20 = vld [vmem:[%s737_s1 + $0x88] sm:$0xff]  ;;  %v31_v22 = vld [vmem:[%s737_s1 + $0x80] sm:$0xff]  ;;  %v493_v10 = vmov 0.0|0.0  }
   0x6   :  { %v432_v19 = vpack.c.bf16 %v36_v17, %v29_v16  ;;  %445 = vmatpush1.bf16.msra.mxu1 %v444_v14  ;;  %v446_v23 = vpack.c.bf16 %v39_v21, %v32_v20  ;;  %v38_v24 = vld [vmem:[%s737_s1 + $0xb8] sm:$0xff]  ;;  %v44_v25 = vld [vmem:[%s737_s1 + $0xe8] sm:$0xff]  ;;  %v51_v26 = vld [vmem:[%s737_s1 + $0x120] sm:$0xff] }
   0x7   :  { %431 = vmatprep.subr.bf16.mxu0 %v430_v18  ;;  %v448_v27 = vpack.c.bf16 %v38_v24, %v31_v22  ;;  %v434_v28 = vpack.c.bf16 %v51_v26, %v44_v25  ;;  %v43_v29 = vld [vmem:[%s737_s1 + $0xe0] sm:$0xff]  ;;  %v50_v30 = vld [vmem:[%s737_s1 + $0x118] sm:$0xff]  ;;  %v53_v32 = vld [vmem:[%s737_s1 + $0x130] sm:$0xff] }
   0x8   :  { %v46_v31 = vld [vmem:[%s737_s1 + $0xf8] sm:$0xff]  ;;  %447 = vmatprep.subr.bf16.mxu1 %v446_v23  ;;  %v45_v33 = vld [vmem:[%s737_s1 + $0xf0] sm:$0xff]  ;;  %v52_v34 = vld [vmem:[%s737_s1 + $0x128] sm:$0xff]  ;;  %v436_v35 = vpack.c.bf16 %v50_v30, %v43_v29 }
   0x9   :  { %433 = vmatpush1.bf16.msra.mxu0 %v432_v19  ;;  %v450_v36 = vpack.c.bf16 %v53_v32, %v46_v31  ;;  %v58_v37 = vld [vmem:[%s737_s1 + $0x158] sm:$0xff]  ;;  %v65_v38 = vld [vmem:[%s737_s1 + $0x190] sm:$0xff]  ;;  %v452_v40 = vpack.c.bf16 %v52_v34, %v45_v33  ;;  %v64_v42 = vld [vmem:[%s737_s1 + $0x188] sm:$0xff] }
   0xa   :  { %v57_v39 = vld [vmem:[%s737_s1 + $0x150] sm:$0xff]  ;;  %449 = vmatpush1.bf16.msra.mxu1 %v448_v27  ;;  %435 = vmatprep.subr.bf16.mxu0 %v434_v28  ;;  %v438_v41 = vpack.c.bf16 %v65_v38, %v58_v37  ;;  %v60_v43 = vld [vmem:[%s737_s1 + $0x168] sm:$0xff]  ;;  %v67_v44 = vld [vmem:[%s737_s1 + $0x1a0] sm:$0xff] }
   0xb   :  { %451 = vmatprep.subr.bf16.mxu1 %v450_v36  ;;  %v454_v45 = vpack.c.bf16 %v67_v44, %v60_v43  ;;  %v59_v46 = vld [vmem:[%s737_s1 + $0x160] sm:$0xff]  ;;  %v66_v47 = vld [vmem:[%s737_s1 + $0x198] sm:$0xff]  ;;  %v440_v48 = vpack.c.bf16 %v64_v42, %v57_v39  ;;  %v72_v50 = vld [vmem:[%s737_s1 + $0x1c8] sm:$0xff] }
   0xc   :  { %v456_v49 = vpack.c.bf16 %v66_v47, %v59_v46  ;;  %v71_v51 = vld [vmem:[%s737_s1 + $0x1c0] sm:$0xff]  ;;  %v74_v52 = vld [vmem:[%s737_s1 + $0x1d8] sm:$0xff]  ;;  %v20_v53 = vld [vmem:[%s737_s1 + $0x28] sm:$0xff] }
   0xd   :  { %437 = vmatpush1.bf16.msra.mxu0 %v436_v35  ;;  %v27_v54 = vld [vmem:[%s737_s1 + $0x60] sm:$0xff]  ;;  %v26_v56 = vld [vmem:[%s737_s1 + $0x58] sm:$0xff]  ;;  %v21_v57 = vld [vmem:[%s737_s1 + $0x30] sm:$0xff] }
   0xe   :  { %453 = vmatpush1.bf16.msra.mxu1 %v452_v40  ;;  %439 = vmatprep.subr.bf16.mxu0 %v438_v41  ;;  %v19_v55 = vld [vmem:[%s737_s1 + $0x20] sm:$0xff]  ;;  %v28_v58 = vld [vmem:[%s737_s1 + $0x68] sm:$0xff]  ;;  %v34_v59 = vld [vmem:[%s737_s1 + $0x98] sm:$0xff]  ;;  %v458_v63 = vpack.c.bf16 %v27_v54, %v20_v53 }
   0xf   :  { %455 = vmatprep.subr.bf16.mxu1 %v454_v45  ;;  %v41_v60 = vld [vmem:[%s737_s1 + $0xd0] sm:$0xff]  ;;  %v649_v61 = vld [vmem:[%s738_s0] sm:$0xf]  ;;  %v460_v0 = vpack.c.bf16 %v26_v56, %v19_v55  ;;  %v475_v1 = vpack.c.bf16 %v28_v58, %v21_v57  ;;  %v40_v5 = vld [vmem:[%s737_s1 + $0xc8] sm:$0xff] }
  0x10   :  { %v73_v62 = vld [vmem:[%s737_s1 + $0x1d0] sm:$0xff]  ;;  %v462_v2 = vpack.c.bf16 %v41_v60, %v34_v59  ;;  %v35_v6 = vld [vmem:[%s737_s1 + $0xa0] sm:$0xff]  ;;  %v42_v7 = vld [vmem:[%s737_s1 + $0xd8] sm:$0xff] }
  0x11   :  { %441 = vmatpush1.bf16.msra.mxu0 %v440_v48  ;;  %v33_v4 = vld [vmem:[%s737_s1 + $0x90] sm:$0xff]  ;;  %v48_v8 = vld [vmem:[%s737_s1 + $0x108] sm:$0xff]  ;;  %v55_v9 = vld [vmem:[%s737_s1 + $0x140] sm:$0xff]  ;;  %v478_v13 = vpack.c.bf16 %v42_v7, %v35_v6 }
  0x12   :  { %457 = vmatpush1.bf16.msra.mxu1 %v456_v49  ;;  %104 = vmatprep.subr.mxu0 %v72_v50  ;;  %v464_v11 = vpack.c.bf16 %v40_v5, %v33_v4  ;;  %v78_v12 = vld [vmem:[%s739_s2] sm:$0xf]  ;;  %v466_v14 = vpack.c.bf16 %v55_v9, %v48_v8  ;;  %v54_v16 = vld [vmem:[%s737_s1 + $0x138] sm:$0xff]  ;;  %v49_v17 = vld [vmem:[%s737_s1 + $0x110] sm:$0xff] }
  0x13   :  { %175 = vmatprep.subr.mxu1 %v74_v52  ;;  %v47_v15 = vld [vmem:[%s737_s1 + $0x100] sm:$0xff]  ;;  %v56_v18 = vld [vmem:[%s737_s1 + $0x148] sm:$0xff]  ;;  %v62_v19 = vld [vmem:[%s737_s1 + $0x178] sm:$0xff]  ;;  %81 = vperm.xlu0 %490, %v78_v12  }
  0x14   :  { %v69_v20 = vld [vmem:[%s737_s1 + $0x1b0] sm:$0xff]  ;;  %v468_v21 = vpack.c.bf16 %v54_v16, %v47_v15  ;;  %v481_v22 = vpack.c.bf16 %v56_v18, %v49_v17  ;;  %v68_v25 = vld [vmem:[%s737_s1 + $0x1a8] sm:$0xff]  ;;  %v63_v26 = vld [vmem:[%s737_s1 + $0x180] sm:$0xff] }
  0x15   :  { %105 = vmatpush1.msra.mxu0 %v71_v51  ;;  %v470_v23 = vpack.c.bf16 %v69_v20, %v62_v19  ;;  %v61_v24 = vld [vmem:[%s737_s1 + $0x170] sm:$0xff]  ;;  %v70_v27 = vld [vmem:[%s737_s1 + $0x1b8] sm:$0xff]  ;;  %v76_v30 = vld [vmem:[%s737_s1 + $0x1e8] sm:$0xff] }
  0x16   :  { %391 = vmatmul.mubr.msk.f32.vlgmr.msra.gmra.mrb[0].mxu0 %vm84_vm0, %v649_v61  ;;  %176 = vmatpush1.msra.mxu1 %v73_v62  ;;  %v472_v28 = vpack.c.bf16 %v68_v25, %v61_v24  ;;  %v484_v29 = vpack.c.bf16 %v70_v27, %v63_v26  ;;  %v75_v31 = vld [vmem:[%s737_s1 + $0x1e0] sm:$0xff]  ;;  %v77_v32 = vld [vmem:[%s737_s1 + $0x1f0] sm:$0xff] }
  0x17   :  { %459 = vmatprep.subr.bf16.mxu0 %v458_v63  ;;  %474 = vmatprep.subr.bf16.mxu1 %v493_v10 }
  0x18   :  { %461 = vmatpush1.bf16.msra.mxu0 %v460_v0  ;;  %392 = vmatmul.mubr.msk.f32.vlgmr.msra.gmra.mrb[0].mxu1 %vm84_vm0, %v649_v61 }
  0x19   :  { %476 = vmatpush3.bf16.msra.mxu1 %v475_v1  ;;  %463 = vmatprep.subr.bf16.mxu0 %v462_v2 }
  0x1a   :  { %477 = vmatprep.subr.bf16.mxu1 %v493_v10  ;;  %294 = vmatprep.mubr.f32.mxu0 %v491_v3 }
  0x1b   :  { %423 = vmatprep.mubr.msk.f32.mxu1 %vm494_vm1, %v491_v3 }
  0x1c   :  { %465 = vmatpush1.bf16.msra.mxu0 %v464_v11 }
  0x1d   :  { %479 = vmatpush3.bf16.msra.mxu1 %v478_v13  ;;  %467 = vmatprep.subr.bf16.mxu0 %v466_v14 }
  0x1e   :  { %480 = vmatprep.subr.bf16.mxu1 %v493_v10 }
  0x20   :  { %469 = vmatpush1.bf16.msra.mxu0 %v468_v21 }
  0x21   :  { %482 = vmatpush3.bf16.msra.mxu1 %v481_v22  ;;  %471 = vmatprep.subr.bf16.mxu0 %v470_v23 }
  0x22   :  { %483 = vmatprep.subr.bf16.mxu1 %v493_v10 }
  0x24   :  { %473 = vmatpush1.bf16.msra.mxu0 %v472_v28 }
  0x25   :  { %485 = vmatpush3.bf16.msra.mxu1 %v484_v29  ;;  %246 = vmatprep.subr.mxu0 %v76_v30 }
  0x26   :  { %421 = vmatprep.subr.mxu1 %v491_v3 }
  0x28   :  { %247 = vmatpush1.msra.mxu0 %v75_v31 }
  0x29   :  { %393 = vmatmul.mubr.msk.f32.vlgmr.msra.gmra.mrb[2].mxu0 %vm84_vm0, %v649_v61  ;;  %422 = vmatpush3.msra.mxu1 %v77_v32 }
  0x2a   :  { %424 = vmatmul.mubr.msk.f32.vlgmr.msra.gmra.mrb[2].mxu1 %vm84_vm0, %v649_v61 }
  0x92   :  { %v82_v33 = vpop.permute.xlu0 %81 }
  0xe9   :  { %v154_v34 = vpop.f32.mrb[0].mxu0 }
  0xea   :  { %v155_v35 = vadd.f32 %v154_v34, %v82_v33  ;;  %v156_v36 = vpop.f32.mrb[1].mxu0 }
  0xeb   :  { %v157_v37 = vadd.f32 %v156_v36, %v82_v33  ;;  %v225_v38 = vpop.f32.mrb[0].mxu1 }
  0xec   :  { %v226_v39 = vadd.f32 %v225_v38, %v82_v33  ;;  %v227_v3 = vpop.f32.mrb[1].mxu1 }
  0xed   :  { %v377_v40 = vcombine.low %v155_v35, %v157_v37  ;;  %v228_v41 = vadd.f32 %v227_v3, %v82_v33 }
  0xef   :  { %383 = vst [vmem:[%s740_s3] sm:$0xff] %v377_v40  ;;  %v378_v42 = vcombine.low %v226_v39, %v228_v41 }
  0xf1   :  { %384 = vst [vmem:[%s740_s3 + $0x8] sm:$0xff] %v378_v42 }
  0xfc   :  { %v296_v43 = vpop.f32.mrb[2].mxu0 }
  0xfd   :  { %v297_v44 = vadd.f32 %v296_v43, %v82_v33  ;;  %v298_v45 = vpop.f32.mrb[3].mxu0  ;;  %v367_v46 = vpop.f32.mrb[2].mxu1 }
  0xfe   :  { %v299_v47 = vadd.f32 %v298_v45, %v82_v33  ;;  %v368_v48 = vadd.f32 %v367_v46, %v82_v33  ;;  %v425_v49 = vpop.f32.mrb[3].mxu1 }
 0x100   :  { %v379_v50 = vcombine.low %v297_v44, %v299_v47  ;;  %386 = vst [vmem:[%s740_s3 + $0x18] sm:$0xf] %v368_v48 }
 0x102   :  { %385 = vst [vmem:[%s740_s3 + $0x10] sm:$0xff] %v379_v50 }

</bundles_post_ra>
